<compile_context>
chip_gen: v6e
topology: v6e:2x2x1
jax: 0.10.0
libtpu: 0.0.40
codegen_flags: <defaults>
</compile_context>

<pallas_src>
import jax
import jax.numpy as jnp
from jax.experimental import pallas as pl
from jax.experimental.pallas import tpu as pltpu

F_IN, HIDDEN, F_OUT = 2, 8, 1     # nn.Linear(2, 8) -> ReLU -> nn.Linear(8, 1)
LANES = 128                       # vreg lane width
SUBLANES = 8                      # vreg sublane granularity
MAX_TR = 512                      # rows of 128 samples per grid step (64K samples)


def _round_up(a, b):
    return ((a + b - 1) // b) * b


def mlp_kernel(x_ref, w1_ref, b1_ref, w2_ref, b2_ref, o_ref):
    # x_ref : (2, TR, 128) VMEM  -- x_ref[k] = feature k for TR*128 samples
    # w1_ref: (2, 8) SMEM   b1_ref: (8,) SMEM
    # w2_ref: (8,)   SMEM   b2_ref: (1,) SMEM
    # o_ref : (TR, 128) VMEM (lane-dense output)
    x0 = x_ref[0]                     # (TR, 128)
    x1 = x_ref[1]                     # (TR, 128)
    acc = jnp.zeros_like(x0)
    for j in range(HIDDEN):           # static unroll over the 8 hidden units
        h = w1_ref[0, j] * x0 + w1_ref[1, j] * x1 + b1_ref[j]
        acc = acc + w2_ref[j] * jnp.maximum(h, 0.0)
    o_ref[...] = acc + b2_ref[0]


def efpnet_forward(x, w1, b1, w2, b2):
    """x: (N, 2). w1: (2,8), b1: (8,), w2: (8,1), b2: (1,). Returns (N, 1) f32."""
    N = x.shape[0]

    # Choose row count / tile so the last two dims are (mult of 8, 128).
    r_needed = _round_up(pl.cdiv(N, LANES), SUBLANES)
    if r_needed <= MAX_TR:
        tr = r_needed
        R = r_needed
    else:
        tr = MAX_TR
        R = _round_up(r_needed, MAX_TR)
    Np = R * LANES

    xf = x.astype(jnp.float32)
    # sample s -> (s // 128, s % 128); feature-major so the kernel reads two
    # fully-dense (TR, 128) slabs per tile.
    xr = jnp.pad(xf, ((0, Np - N), (0, 0))).T.reshape(F_IN, R, LANES)

    w1f = w1.astype(jnp.float32).reshape(F_IN, HIDDEN)
    b1f = b1.astype(jnp.float32).reshape(HIDDEN)
    w2f = w2.astype(jnp.float32).reshape(HIDDEN)
    b2f = b2.astype(jnp.float32).reshape(F_OUT)

    smem_spec = pl.BlockSpec(memory_space=pltpu.MemorySpace.SMEM)

    out = pl.pallas_call(
        mlp_kernel,
        out_shape=jax.ShapeDtypeStruct((R, LANES), jnp.float32),
        grid_spec=pltpu.PrefetchScalarGridSpec(
            num_scalar_prefetch=0,
            grid=(R // tr,),
            in_specs=[
                pl.BlockSpec((F_IN, tr, LANES), lambda i: (0, i, 0)),  # x tile
                smem_spec,   # w1 (2,8)   scalars
                smem_spec,   # b1 (8,)
                smem_spec,   # w2 (8,)
                smem_spec,   # b2 (1,)
            ],
            out_specs=pl.BlockSpec((tr, LANES), lambda i: (i, 0)),
        ),
        compiler_params=pltpu.CompilerParams(
            dimension_semantics=("parallel",),   # v7x: shard batch across both TCs
        ),
        cost_estimate=pl.CostEstimate(
            flops=N * 2 * (F_IN * HIDDEN + HIDDEN * F_OUT),
            transcendentals=0,
            bytes_accessed=N * (F_IN + F_OUT) * 4,
        ),
    )(xr, w1f, b1f, w2f, b2f)

    # Padded samples compute relu(b1)@w2 + b2 (nonzero) but are sliced off here.
    return out.reshape(Np, 1)[:N]


def init_params(key):
    """Deterministic init mimicking PyTorch nn.Linear default U(-1/sqrt(fan_in), +)."""
    k1, k2, k3, k4 = jax.random.split(key, 4)
    bound1 = 1.0 / (F_IN ** 0.5)
    bound2 = 1.0 / (HIDDEN ** 0.5)
    w1 = jax.random.uniform(k1, (F_IN, HIDDEN), jnp.float32, -bound1, bound1)
    b1 = jax.random.uniform(k2, (HIDDEN,), jnp.float32, -bound1, bound1)
    w2 = jax.random.uniform(k3, (HIDDEN, F_OUT), jnp.float32, -bound2, bound2)
    b2 = jax.random.uniform(k4, (F_OUT,), jnp.float32, -bound2, bound2)
    return w1, b1, w2, b2


def reference_forward(x, w1, b1, w2, b2):
    h = jnp.maximum(x @ w1 + b1, 0.0)
    return h @ w2 + b2


if __name__ == "__main__":
    key = jax.random.PRNGKey(0)
    kx, kp = jax.random.split(key)
    w1, b1, w2, b2 = init_params(kp)

    # Small shapes: exercise single-tile path and a non-trivial (>128) batch.
    for N in (8, 300):
        x = jax.random.normal(jax.random.fold_in(kx, N), (N, F_IN), jnp.float32)
        y = jax.block_until_ready(efpnet_forward(x, w1, b1, w2, b2))
        y_ref = reference_forward(x, w1, b1, w2, b2)
        assert y.shape == (N, F_OUT), y.shape
        assert jnp.allclose(y, y_ref, atol=1e-5, rtol=1e-5), (y, y_ref)

    print("KERNEL_OK")
</pallas_src>

<mosaic_0001>
module attributes {stable_mosaic.version = 11 : i64} {
  func.func @mlp_kernel(%arg0: i32, %arg1: memref<2x8x128xf32, #tpu.memory_space<vmem>>, %arg2: memref<2x8xf32, #tpu.memory_space<smem>>, %arg3: memref<8xf32, #tpu.memory_space<smem>>, %arg4: memref<8xf32, #tpu.memory_space<smem>>, %arg5: memref<1xf32, #tpu.memory_space<smem>>, %arg6: memref<8x128xf32, #tpu.memory_space<vmem>>) attributes {dimension_semantics = [#tpu.dimension_semantics<parallel>], iteration_bounds = array<i64: 1>, scalar_prefetch = 0 : i64, scratch_operands = 0 : i64, tpu.core_type = #tpu.core_type<tc>, window_params = [{transform_indices = @transform_0, window_bounds = array<i64: 2, 8, 128>}, {transform_indices = @transform_1, window_bounds = array<i64: 2, 8>}, {transform_indices = @transform_2, window_bounds = array<i64: 8>}, {transform_indices = @transform_3, window_bounds = array<i64: 8>}, {transform_indices = @transform_4, window_bounds = array<i64: 1>}, {transform_indices = @transform_5, window_bounds = array<i64: 8, 128>}]} {
    %c0 = arith.constant 0 : index
    %c0_0 = arith.constant 0 : index
    %c0_1 = arith.constant 0 : index
    %0 = vector.load %arg1[%c0, %c0_0, %c0_1] : memref<2x8x128xf32, #tpu.memory_space<vmem>>, vector<1x8x128xf32>
    %1 = vector.shape_cast %0 : vector<1x8x128xf32> to vector<8x128xf32>
    %c1 = arith.constant 1 : index
    %c0_2 = arith.constant 0 : index
    %c0_3 = arith.constant 0 : index
    %2 = vector.load %arg1[%c1, %c0_2, %c0_3] : memref<2x8x128xf32, #tpu.memory_space<vmem>>, vector<1x8x128xf32>
    %3 = vector.shape_cast %2 : vector<1x8x128xf32> to vector<8x128xf32>
    %cst = arith.constant 0.000000e+00 : f32
    %4 = vector.broadcast %cst : f32 to vector<8x128xf32>
    %c0_4 = arith.constant 0 : index
    %c0_5 = arith.constant 0 : index
    %5 = memref.load %arg2[%c0_4, %c0_5] : memref<2x8xf32, #tpu.memory_space<smem>>
    %6 = vector.broadcast %5 : f32 to vector<8x128xf32>
    %7 = arith.mulf %6, %1 : vector<8x128xf32>
    %c1_6 = arith.constant 1 : index
    %c0_7 = arith.constant 0 : index
    %8 = memref.load %arg2[%c1_6, %c0_7] : memref<2x8xf32, #tpu.memory_space<smem>>
    %9 = vector.broadcast %8 : f32 to vector<8x128xf32>
    %10 = arith.mulf %9, %3 : vector<8x128xf32>
    %11 = arith.addf %7, %10 : vector<8x128xf32>
    %c0_8 = arith.constant 0 : index
    %12 = memref.load %arg3[%c0_8] : memref<8xf32, #tpu.memory_space<smem>>
    %13 = vector.broadcast %12 : f32 to vector<8x128xf32>
    %14 = arith.addf %11, %13 : vector<8x128xf32>
    %c0_9 = arith.constant 0 : index
    %15 = memref.load %arg4[%c0_9] : memref<8xf32, #tpu.memory_space<smem>>
    %cst_10 = arith.constant 0.000000e+00 : f32
    %16 = vector.broadcast %cst_10 : f32 to vector<8x128xf32>
    %17 = arith.maximumf %14, %16 : vector<8x128xf32>
    %18 = vector.broadcast %15 : f32 to vector<8x128xf32>
    %19 = arith.mulf %18, %17 : vector<8x128xf32>
    %20 = arith.addf %4, %19 : vector<8x128xf32>
    %c0_11 = arith.constant 0 : index
    %c1_12 = arith.constant 1 : index
    %21 = memref.load %arg2[%c0_11, %c1_12] : memref<2x8xf32, #tpu.memory_space<smem>>
    %22 = vector.broadcast %21 : f32 to vector<8x128xf32>
    %23 = arith.mulf %22, %1 : vector<8x128xf32>
    %c1_13 = arith.constant 1 : index
    %c1_14 = arith.constant 1 : index
    %24 = memref.load %arg2[%c1_13, %c1_14] : memref<2x8xf32, #tpu.memory_space<smem>>
    %25 = vector.broadcast %24 : f32 to vector<8x128xf32>
    %26 = arith.mulf %25, %3 : vector<8x128xf32>
    %27 = arith.addf %23, %26 : vector<8x128xf32>
    %c1_15 = arith.constant 1 : index
    %28 = memref.load %arg3[%c1_15] : memref<8xf32, #tpu.memory_space<smem>>
    %29 = vector.broadcast %28 : f32 to vector<8x128xf32>
    %30 = arith.addf %27, %29 : vector<8x128xf32>
    %c1_16 = arith.constant 1 : index
    %31 = memref.load %arg4[%c1_16] : memref<8xf32, #tpu.memory_space<smem>>
    %cst_17 = arith.constant 0.000000e+00 : f32
    %32 = vector.broadcast %cst_17 : f32 to vector<8x128xf32>
    %33 = arith.maximumf %30, %32 : vector<8x128xf32>
    %34 = vector.broadcast %31 : f32 to vector<8x128xf32>
    %35 = arith.mulf %34, %33 : vector<8x128xf32>
    %36 = arith.addf %20, %35 : vector<8x128xf32>
    %c0_18 = arith.constant 0 : index
    %c2 = arith.constant 2 : index
    %37 = memref.load %arg2[%c0_18, %c2] : memref<2x8xf32, #tpu.memory_space<smem>>
    %38 = vector.broadcast %37 : f32 to vector<8x128xf32>
    %39 = arith.mulf %38, %1 : vector<8x128xf32>
    %c1_19 = arith.constant 1 : index
    %c2_20 = arith.constant 2 : index
    %40 = memref.load %arg2[%c1_19, %c2_20] : memref<2x8xf32, #tpu.memory_space<smem>>
    %41 = vector.broadcast %40 : f32 to vector<8x128xf32>
    %42 = arith.mulf %41, %3 : vector<8x128xf32>
    %43 = arith.addf %39, %42 : vector<8x128xf32>
    %c2_21 = arith.constant 2 : index
    %44 = memref.load %arg3[%c2_21] : memref<8xf32, #tpu.memory_space<smem>>
    %45 = vector.broadcast %44 : f32 to vector<8x128xf32>
    %46 = arith.addf %43, %45 : vector<8x128xf32>
    %c2_22 = arith.constant 2 : index
    %47 = memref.load %arg4[%c2_22] : memref<8xf32, #tpu.memory_space<smem>>
    %cst_23 = arith.constant 0.000000e+00 : f32
    %48 = vector.broadcast %cst_23 : f32 to vector<8x128xf32>
    %49 = arith.maximumf %46, %48 : vector<8x128xf32>
    %50 = vector.broadcast %47 : f32 to vector<8x128xf32>
    %51 = arith.mulf %50, %49 : vector<8x128xf32>
    %52 = arith.addf %36, %51 : vector<8x128xf32>
    %c0_24 = arith.constant 0 : index
    %c3 = arith.constant 3 : index
    %53 = memref.load %arg2[%c0_24, %c3] : memref<2x8xf32, #tpu.memory_space<smem>>
    %54 = vector.broadcast %53 : f32 to vector<8x128xf32>
    %55 = arith.mulf %54, %1 : vector<8x128xf32>
    %c1_25 = arith.constant 1 : index
    %c3_26 = arith.constant 3 : index
    %56 = memref.load %arg2[%c1_25, %c3_26] : memref<2x8xf32, #tpu.memory_space<smem>>
    %57 = vector.broadcast %56 : f32 to vector<8x128xf32>
    %58 = arith.mulf %57, %3 : vector<8x128xf32>
    %59 = arith.addf %55, %58 : vector<8x128xf32>
    %c3_27 = arith.constant 3 : index
    %60 = memref.load %arg3[%c3_27] : memref<8xf32, #tpu.memory_space<smem>>
    %61 = vector.broadcast %60 : f32 to vector<8x128xf32>
    %62 = arith.addf %59, %61 : vector<8x128xf32>
    %c3_28 = arith.constant 3 : index
    %63 = memref.load %arg4[%c3_28] : memref<8xf32, #tpu.memory_space<smem>>
    %cst_29 = arith.constant 0.000000e+00 : f32
    %64 = vector.broadcast %cst_29 : f32 to vector<8x128xf32>
    %65 = arith.maximumf %62, %64 : vector<8x128xf32>
    %66 = vector.broadcast %63 : f32 to vector<8x128xf32>
    %67 = arith.mulf %66, %65 : vector<8x128xf32>
    %68 = arith.addf %52, %67 : vector<8x128xf32>
    %c0_30 = arith.constant 0 : index
    %c4 = arith.constant 4 : index
    %69 = memref.load %arg2[%c0_30, %c4] : memref<2x8xf32, #tpu.memory_space<smem>>
    %70 = vector.broadcast %69 : f32 to vector<8x128xf32>
    %71 = arith.mulf %70, %1 : vector<8x128xf32>
    %c1_31 = arith.constant 1 : index
    %c4_32 = arith.constant 4 : index
    %72 = memref.load %arg2[%c1_31, %c4_32] : memref<2x8xf32, #tpu.memory_space<smem>>
    %73 = vector.broadcast %72 : f32 to vector<8x128xf32>
    %74 = arith.mulf %73, %3 : vector<8x128xf32>
    %75 = arith.addf %71, %74 : vector<8x128xf32>
    %c4_33 = arith.constant 4 : index
    %76 = memref.load %arg3[%c4_33] : memref<8xf32, #tpu.memory_space<smem>>
    %77 = vector.broadcast %76 : f32 to vector<8x128xf32>
    %78 = arith.addf %75, %77 : vector<8x128xf32>
    %c4_34 = arith.constant 4 : index
    %79 = memref.load %arg4[%c4_34] : memref<8xf32, #tpu.memory_space<smem>>
    %cst_35 = arith.constant 0.000000e+00 : f32
    %80 = vector.broadcast %cst_35 : f32 to vector<8x128xf32>
    %81 = arith.maximumf %78, %80 : vector<8x128xf32>
    %82 = vector.broadcast %79 : f32 to vector<8x128xf32>
    %83 = arith.mulf %82, %81 : vector<8x128xf32>
    %84 = arith.addf %68, %83 : vector<8x128xf32>
    %c0_36 = arith.constant 0 : index
    %c5 = arith.constant 5 : index
    %85 = memref.load %arg2[%c0_36, %c5] : memref<2x8xf32, #tpu.memory_space<smem>>
    %86 = vector.broadcast %85 : f32 to vector<8x128xf32>
    %87 = arith.mulf %86, %1 : vector<8x128xf32>
    %c1_37 = arith.constant 1 : index
    %c5_38 = arith.constant 5 : index
    %88 = memref.load %arg2[%c1_37, %c5_38] : memref<2x8xf32, #tpu.memory_space<smem>>
    %89 = vector.broadcast %88 : f32 to vector<8x128xf32>
    %90 = arith.mulf %89, %3 : vector<8x128xf32>
    %91 = arith.addf %87, %90 : vector<8x128xf32>
    %c5_39 = arith.constant 5 : index
    %92 = memref.load %arg3[%c5_39] : memref<8xf32, #tpu.memory_space<smem>>
    %93 = vector.broadcast %92 : f32 to vector<8x128xf32>
    %94 = arith.addf %91, %93 : vector<8x128xf32>
    %c5_40 = arith.constant 5 : index
    %95 = memref.load %arg4[%c5_40] : memref<8xf32, #tpu.memory_space<smem>>
    %cst_41 = arith.constant 0.000000e+00 : f32
    %96 = vector.broadcast %cst_41 : f32 to vector<8x128xf32>
    %97 = arith.maximumf %94, %96 : vector<8x128xf32>
    %98 = vector.broadcast %95 : f32 to vector<8x128xf32>
    %99 = arith.mulf %98, %97 : vector<8x128xf32>
    %100 = arith.addf %84, %99 : vector<8x128xf32>
    %c0_42 = arith.constant 0 : index
    %c6 = arith.constant 6 : index
    %101 = memref.load %arg2[%c0_42, %c6] : memref<2x8xf32, #tpu.memory_space<smem>>
    %102 = vector.broadcast %101 : f32 to vector<8x128xf32>
    %103 = arith.mulf %102, %1 : vector<8x128xf32>
    %c1_43 = arith.constant 1 : index
    %c6_44 = arith.constant 6 : index
    %104 = memref.load %arg2[%c1_43, %c6_44] : memref<2x8xf32, #tpu.memory_space<smem>>
    %105 = vector.broadcast %104 : f32 to vector<8x128xf32>
    %106 = arith.mulf %105, %3 : vector<8x128xf32>
    %107 = arith.addf %103, %106 : vector<8x128xf32>
    %c6_45 = arith.constant 6 : index
    %108 = memref.load %arg3[%c6_45] : memref<8xf32, #tpu.memory_space<smem>>
    %109 = vector.broadcast %108 : f32 to vector<8x128xf32>
    %110 = arith.addf %107, %109 : vector<8x128xf32>
    %c6_46 = arith.constant 6 : index
    %111 = memref.load %arg4[%c6_46] : memref<8xf32, #tpu.memory_space<smem>>
    %cst_47 = arith.constant 0.000000e+00 : f32
    %112 = vector.broadcast %cst_47 : f32 to vector<8x128xf32>
    %113 = arith.maximumf %110, %112 : vector<8x128xf32>
    %114 = vector.broadcast %111 : f32 to vector<8x128xf32>
    %115 = arith.mulf %114, %113 : vector<8x128xf32>
    %116 = arith.addf %100, %115 : vector<8x128xf32>
    %c0_48 = arith.constant 0 : index
    %c7 = arith.constant 7 : index
    %117 = memref.load %arg2[%c0_48, %c7] : memref<2x8xf32, #tpu.memory_space<smem>>
    %118 = vector.broadcast %117 : f32 to vector<8x128xf32>
    %119 = arith.mulf %118, %1 : vector<8x128xf32>
    %c1_49 = arith.constant 1 : index
    %c7_50 = arith.constant 7 : index
    %120 = memref.load %arg2[%c1_49, %c7_50] : memref<2x8xf32, #tpu.memory_space<smem>>
    %121 = vector.broadcast %120 : f32 to vector<8x128xf32>
    %122 = arith.mulf %121, %3 : vector<8x128xf32>
    %123 = arith.addf %119, %122 : vector<8x128xf32>
    %c7_51 = arith.constant 7 : index
    %124 = memref.load %arg3[%c7_51] : memref<8xf32, #tpu.memory_space<smem>>
    %125 = vector.broadcast %124 : f32 to vector<8x128xf32>
    %126 = arith.addf %123, %125 : vector<8x128xf32>
    %c7_52 = arith.constant 7 : index
    %127 = memref.load %arg4[%c7_52] : memref<8xf32, #tpu.memory_space<smem>>
    %cst_53 = arith.constant 0.000000e+00 : f32
    %128 = vector.broadcast %cst_53 : f32 to vector<8x128xf32>
    %129 = arith.maximumf %126, %128 : vector<8x128xf32>
    %130 = vector.broadcast %127 : f32 to vector<8x128xf32>
    %131 = arith.mulf %130, %129 : vector<8x128xf32>
    %132 = arith.addf %116, %131 : vector<8x128xf32>
    %c0_54 = arith.constant 0 : index
    %133 = memref.load %arg5[%c0_54] : memref<1xf32, #tpu.memory_space<smem>>
    %134 = vector.broadcast %133 : f32 to vector<8x128xf32>
    %135 = arith.addf %132, %134 : vector<8x128xf32>
    %c0_55 = arith.constant 0 : index
    %c0_56 = arith.constant 0 : index
    %136 = vector.load %arg6[%c0_55, %c0_56] : memref<8x128xf32, #tpu.memory_space<vmem>>, vector<8x128xf32>
    tpu.vector_store %arg6[%c0_55, %c0_56], %135 {strides = array<i32>} : memref<8x128xf32, #tpu.memory_space<vmem>>, vector<8x128xf32>,
    return
  }
  func.func @transform_0(%arg0: i32) -> (i32, i32, i32) {
    %c0_i32 = arith.constant 0 : i32
    %c0_i32_0 = arith.constant 0 : i32
    %c0_i32_1 = arith.constant 0 : i32
    return %c0_i32, %arg0, %c0_i32_0 : i32, i32, i32
  }
  func.func @transform_1(%arg0: i32) -> (i32, i32) {
    %c0_i32 = arith.constant 0 : i32
    %c0_i32_0 = arith.constant 0 : i32
    %c0_i32_1 = arith.constant 0 : i32
    return %c0_i32, %c0_i32_0 : i32, i32
  }
  func.func @transform_2(%arg0: i32) -> i32 {
    %c0_i32 = arith.constant 0 : i32
    %c0_i32_0 = arith.constant 0 : i32
    return %c0_i32 : i32
  }
  func.func @transform_3(%arg0: i32) -> i32 {
    %c0_i32 = arith.constant 0 : i32
    %c0_i32_0 = arith.constant 0 : i32
    return %c0_i32 : i32
  }
  func.func @transform_4(%arg0: i32) -> i32 {
    %c0_i32 = arith.constant 0 : i32
    %c0_i32_0 = arith.constant 0 : i32
    return %c0_i32 : i32
  }
  func.func @transform_5(%arg0: i32) -> (i32, i32) {
    %c0_i32 = arith.constant 0 : i32
    %c0_i32_0 = arith.constant 0 : i32
    return %arg0, %c0_i32 : i32, i32
  }
}

</mosaic_0001>

<bundles_post_ra>
// kernel: tpu_custom_call.1
= control target key start
LH: loop header
LB: loop body
LE: loop exit
PB: predicated region body
PF: predicated region fallthrough
CT: control target
= control target key end

     0   :  { %11 = vsyncpa [#allocation4], 0  ;;  %s447_s0 = inlined_call_operand.hbm [shape: f32[2,8,128], index: 0, kind: input, shape index: {}]   ;;  %s448_s1 = inlined_call_operand.vmem [shape: f32[2,8], index: 1, kind: input, shape index: {}]   ;;  %s449_s2 = inlined_call_operand.vmem [shape: f32[8], index: 2, kind: input, shape index: {}]   ;;  %s450_s3 = inlined_call_operand.vmem [shape: f32[8], index: 3, kind: input, shape index: {}]   ;;  %s451_s4 = inlined_call_operand.<no memory space> [shape: f32[1], index: 4, kind: input, shape index: {}]   ;;  %s452_s5 = inlined_call_operand.hbm [shape: f32[8,128], index: 5, kind: output, shape index: {}]  }
   0x1   :  { %12 = vsyncpa [#allocation6], 0 }
   0x2   :  { %13 = vsyncpa [#allocation9], 0  ;;  %s43_s20 = sshll.u32 %s449_s2, 4  ;;  %s44_s20 = int_to_ptr.vmem [resolvable:$true] %s43_s20 }
   0x3   :  { %14 = vsyncpa [#allocation5], 0  ;;  %s252_s21 = scalar_lea.vmem %s44_s20, 16  ;;  %p257_p1 = scmp.lt.s32.totalorder %s44_s20, %s44_s20 }
   0x4   :  { %p253_p0 = scmp.ne.s32.totalorder %s44_s20, %s252_s21  ;;  %p258_p2 = scmp.lt.s32.totalorder %s252_s21, %s252_s21 }
   0x6   :  { %p259_p3 = por %p258_p2, %p257_p1 }
   0x8   :  { %p260_p4 = pnand %p259_p3, %p253_p0 }
   0xa   :  { %263 = shalt.err (!%p260_p4)
}
   0xb   :  { %s336_s22 = smov [#allocation8]   ;;  %s337_s23 = smov [#allocation3]  }
   0xc   :  { %46 = dma.vmem_to_smem %s44_s20, 16, %s336_s22, [#allocation9]  }
   0xd   :  { %s20_s24 = sshll.u32 %s337_s23, 4  ;;  %s21_s24 = int_to_ptr.vmem [resolvable:$true] %s20_s24 }
   0xe   :  { %s272_s25 = scalar_lea.vmem %s21_s24, 256  ;;  %p277_p6 = scmp.lt.s32.totalorder %s21_s24, %s21_s24 }
   0xf   :  { %p273_p5 = scmp.ne.s32.totalorder %s21_s24, %s272_s25  ;;  %p278_p7 = scmp.lt.s32.totalorder %s272_s25, %s272_s25 }
  0x11   :  { %p279_p8 = por %p278_p7, %p277_p6 }
  0x13   :  { %p280_p9 = pnand %p279_p8, %p273_p5 }
  0x15   :  { %283 = shalt.err (!%p280_p9)
}
  0x16   :  { %s338_s2 = smov 128   ;;  %s339_s26 = smov 8  }
  0x17   :  { %26 = dma.hbm_to_vmem [thread:$0]  %s447_s0, 256, %s21_s24, [#allocation4], %s338_s2, %s338_s2, %s339_s26  }
  0x18   :  { %s33_s6 = sshll.u32 %s448_s1, 4  ;;  %s53_s9 = sshll.u32 %s450_s3, 4  ;;  %s34_s6 = int_to_ptr.vmem [resolvable:$true] %s33_s6  ;;  %s54_s9 = int_to_ptr.vmem [resolvable:$true] %s53_s9 }
  0x19   :  { %s284_s10 = scalar_lea.vmem %s34_s6, 32  ;;  %p289_p11 = scmp.lt.s32.totalorder %s34_s6, %s34_s6 }
  0x1a   :  { %p285_p10 = scmp.ne.s32.totalorder %s34_s6, %s284_s10  ;;  %p290_p12 = scmp.lt.s32.totalorder %s284_s10, %s284_s10 }
  0x1c   :  { %p291_p13 = por %p290_p12, %p289_p11 }
  0x1e   :  { %p292_p0 = pnand %p291_p13, %p285_p10 }
  0x20   :  { %295 = shalt.err (!%p292_p0)
}
  0x21   :  { %s340_s11 = smov [#allocation7]   ;;  %s296_s0 = scalar_lea.vmem %s54_s9, 16 }
  0x22   :  { %36 = dma.vmem_to_smem %s34_s6, 32, %s340_s11, [#allocation6]  }
  0x23   :  { %p297_p1 = scmp.ne.s32.totalorder %s54_s9, %s296_s0  ;;  %p301_p2 = scmp.lt.s32.totalorder %s54_s9, %s54_s9 }
  0x24   :  { %p302_p3 = scmp.lt.s32.totalorder %s296_s0, %s296_s0 }
  0x26   :  { %p303_p4 = por %p302_p3, %p301_p2 }
  0x28   :  { %p304_p5 = pnand %p303_p4, %p297_p1 }
  0x2a   :  { %307 = shalt.err (!%p304_p5)
}
  0x2b   :  { %s341_s1 = smov [#allocation10]  }
  0x2c   :  { %56 = dma.vmem_to_smem %s54_s9, 16, %s341_s1, [#allocation9]  }
  0x2d   :  { %328 = dma.done.wait [#allocation4], 256  }
  0x2e   :  { %329 = vsyncadd [#allocation4], 4294967040 }
  0x2f   :  { %330 = dma.done.wait [#allocation6], 32  }
  0x30   :  { %331 = vsyncadd [#allocation6], 4294967264 }
  0x31   :  { %332 = dma.done.wait [#allocation9], 32  }
  0x32   :  { %333 = vsyncadd [#allocation9], 4294967264 }
  0x33   :  { %71 = sfence }
  0x34   :  { %s75_s3 = sld [smem:[#allocation7]]  ;;  %v387_v0 = vld [vmem:[#allocation3] sm:$0xff]  ;;  %v389_v1 = vld [vmem:[#allocation3 + $0x8] sm:$0xff] }
  0x35   :  { %s216_s12 = sld [smem:[#allocation7 + $0x80]] }
  0x36   :  { %s82_s13 = sld [smem:[#allocation8]] }
  0x37   :  { %s385_s14 = sld [smem:[#allocation10]] }
  0x38   :  { %s217_s15 = sld [smem:[#allocation7 + $0x1]] }
  0x39   :  { %s218_s16 = sld [smem:[#allocation7 + $0x81]] }
  0x3a   :  { %v76_v2 = vstv %s75_s3  ;;  %s219_s17 = sld [smem:[#allocation8 + $0x1]] }
  0x3b   :  { %v77_v3 = vmul.f32 %v76_v2, %v387_v0  ;;  %v79_v4 = vstv %s216_s12  ;;  %s392_s18 = sld [smem:[#allocation10 + $0x1]] }
  0x3c   :  { %v80_v5 = vmul.f32 %v79_v4, %v389_v1  ;;  %s221_s19 = sld [smem:[#allocation7 + $0x2]]  ;;  %v83_v6 = vstv %s82_s13 }
  0x3d   :  { %s222_s20 = sld [smem:[#allocation7 + $0x82]]  ;;  %v87_v17 = vstv %s385_s14 }
  0x3e   :  { %v81_v7 = vadd.f32 %v80_v5, %v77_v3  ;;  %v91_v8 = vstv %s217_s15  ;;  %s395_s21 = sld [smem:[#allocation8 + $0x2]] }
  0x3f   :  { %v92_v9 = vmul.f32 %v91_v8, %v387_v0  ;;  %v94_v10 = vstv %s218_s16  ;;  %s398_s22 = sld [smem:[#allocation10 + $0x2]]  ;;  %s342_s16 = smov [#allocation11]  }
  0x40   :  { %v84_v11 = vadd.f32 %v83_v6, %v81_v7  ;;  %v95_v12 = vmul.f32 %v94_v10, %v389_v1  ;;  %s225_s23 = sld [smem:[#allocation7 + $0x3]]  ;;  %v98_v13 = vstv %s219_s17  ;;  %s205_s17 = sshll.u32 %s342_s16, 4  ;;  %s206_s17 = int_to_ptr.vmem [resolvable:$true] %s205_s17 }
  0x41   :  { %s226_s24 = sld [smem:[#allocation7 + $0x83]]  ;;  %v102_v22 = vstv %s392_s18  ;;  %s308_s18 = scalar_lea.vmem %s206_s17, 128 }
  0x42   :  { %v86_v14 = vmax.f32 %v84_v11, 0.0  ;;  %v96_v15 = vadd.f32 %v95_v12, %v92_v9  ;;  %v106_v16 = vstv %s221_s19  ;;  %s401_s25 = sld [smem:[#allocation8 + $0x3]]  ;;  %p309_p6 = scmp.ne.s32.totalorder %s206_s17, %s308_s18 }
  0x43   :  { %v107_v18 = vmul.f32 %v106_v16, %v387_v0  ;;  %v109_v19 = vstv %s222_s20  ;;  %s405_s2 = sld [smem:[#allocation10 + $0x3]]  ;;  %p313_p7 = scmp.lt.s32.totalorder %s206_s17, %s206_s17 }
  0x44   :  { %v99_v20 = vadd.f32 %v98_v13, %v96_v15  ;;  %v110_v21 = vmul.f32 %v109_v19, %v389_v1  ;;  %s229_s26 = sld [smem:[#allocation7 + $0x4]]  ;;  %v113_v23 = vstv %s395_s21  ;;  %v88_v24 = vmul.f32 %v87_v17, %v86_v14  ;;  %p314_p8 = scmp.lt.s32.totalorder %s308_s18, %s308_s18 }
  0x45   :  { %s230_s27 = sld [smem:[#allocation7 + $0x84]]  ;;  %v117_v33 = vstv %s398_s22 }
  0x46   :  { %v101_v25 = vmax.f32 %v99_v20, 0.0  ;;  %v111_v26 = vadd.f32 %v110_v21, %v107_v18  ;;  %v121_v27 = vstv %s225_s23  ;;  %s410_s28 = sld [smem:[#allocation8 + $0x4]]  ;;  %p315_p9 = por %p314_p8, %p313_p7 }
  0x47   :  { %v122_v28 = vmul.f32 %v121_v27, %v387_v0  ;;  %v124_v29 = vstv %s226_s24  ;;  %s413_s29 = sld [smem:[#allocation10 + $0x4]] }
  0x48   :  { %v103_v30 = vmul.f32 %v102_v22, %v101_v25  ;;  %v114_v31 = vadd.f32 %v113_v23, %v111_v26  ;;  %v125_v32 = vmul.f32 %v124_v29, %v389_v1  ;;  %s233_s30 = sld [smem:[#allocation7 + $0x5]]  ;;  %v128_v34 = vstv %s401_s25  ;;  %p316_p10 = pnand %p315_p9, %p309_p6 }
  0x49   :  { %s234_s6 = sld [smem:[#allocation7 + $0x85]]  ;;  %v132_v44 = vstv %s405_s2 }
  0x4a   :  { %v104_v35 = vadd.f32 %v103_v30, %v88_v24  ;;  %v116_v36 = vmax.f32 %v114_v31, 0.0  ;;  %v126_v37 = vadd.f32 %v125_v32, %v122_v28  ;;  %v136_v38 = vstv %s229_s26  ;;  %s418_s7 = sld [smem:[#allocation8 + $0x5]] }
  0x4b   :  { %v137_v39 = vmul.f32 %v136_v38, %v387_v0  ;;  %v139_v40 = vstv %s230_s27  ;;  %s421_s8 = sld [smem:[#allocation10 + $0x5]] }
  0x4c   :  { %v118_v41 = vmul.f32 %v117_v33, %v116_v36  ;;  %v129_v42 = vadd.f32 %v128_v34, %v126_v37  ;;  %v140_v43 = vmul.f32 %v139_v40, %v389_v1  ;;  %s237_s9 = sld [smem:[#allocation7 + $0x6]]  ;;  %v143_v45 = vstv %s410_s28 }
  0x4d   :  { %s238_s10 = sld [smem:[#allocation7 + $0x86]]  ;;  %v147_v55 = vstv %s413_s29 }
  0x4e   :  { %v119_v46 = vadd.f32 %v118_v41, %v104_v35  ;;  %v131_v47 = vmax.f32 %v129_v42, 0.0  ;;  %v141_v48 = vadd.f32 %v140_v43, %v137_v39  ;;  %v151_v49 = vstv %s233_s30  ;;  %s426_s11 = sld [smem:[#allocation8 + $0x6]] }
  0x4f   :  { %v152_v50 = vmul.f32 %v151_v49, %v387_v0  ;;  %v154_v51 = vstv %s234_s6  ;;  %s429_s0 = sld [smem:[#allocation10 + $0x6]] }
  0x50   :  { %v133_v52 = vmul.f32 %v132_v44, %v131_v47  ;;  %v144_v53 = vadd.f32 %v143_v45, %v141_v48  ;;  %v155_v54 = vmul.f32 %v154_v51, %v389_v1  ;;  %s241_s1 = sld [smem:[#allocation7 + $0x7]]  ;;  %v158_v56 = vstv %s418_s7 }
  0x51   :  { %s242_s3 = sld [smem:[#allocation7 + $0x87]]  ;;  %v162_v4 = vstv %s421_s8 }
  0x52   :  { %v134_v57 = vadd.f32 %v133_v52, %v119_v46  ;;  %v146_v58 = vmax.f32 %v144_v53, 0.0  ;;  %v156_v59 = vadd.f32 %v155_v54, %v152_v50  ;;  %v166_v60 = vstv %s237_s9  ;;  %s243_s12 = sld [smem:[#allocation8 + $0x7]] }
  0x53   :  { %v167_v61 = vmul.f32 %v166_v60, %v387_v0  ;;  %v169_v62 = vstv %s238_s10  ;;  %s244_s13 = sld [smem:[#allocation10 + $0x7]] }
  0x54   :  { %v148_v63 = vmul.f32 %v147_v55, %v146_v58  ;;  %v159_v2 = vadd.f32 %v158_v56, %v156_v59  ;;  %v170_v3 = vmul.f32 %v169_v62, %v389_v1  ;;  %v173_v5 = vstv %s426_s11 }
  0x55   :  { %v177_v15 = vstv %s429_s0 }
  0x56   :  { %v149_v6 = vadd.f32 %v148_v63, %v134_v57  ;;  %v161_v7 = vmax.f32 %v159_v2, 0.0  ;;  %v171_v8 = vadd.f32 %v170_v3, %v167_v61  ;;  %v181_v9 = vstv %s241_s1 }
  0x57   :  { %v182_v10 = vmul.f32 %v181_v9, %v387_v0  ;;  %v184_v11 = vstv %s242_s3  ;;  %v196_v0 = vstv %s451_s4 }
  0x58   :  { %v163_v12 = vmul.f32 %v162_v4, %v161_v7  ;;  %v174_v13 = vadd.f32 %v173_v5, %v171_v8  ;;  %v185_v14 = vmul.f32 %v184_v11, %v389_v1  ;;  %v188_v16 = vstv %s243_s12 }
  0x59   :  { %v192_v22 = vstv %s244_s13 }
  0x5a   :  { %v164_v17 = vadd.f32 %v163_v12, %v149_v6  ;;  %v176_v18 = vmax.f32 %v174_v13, 0.0  ;;  %v186_v19 = vadd.f32 %v185_v14, %v182_v10 }
  0x5c   :  { %v178_v20 = vmul.f32 %v177_v15, %v176_v18  ;;  %v189_v21 = vadd.f32 %v188_v16, %v186_v19 }
  0x5e   :  { %v179_v23 = vadd.f32 %v178_v20, %v164_v17  ;;  %v191_v24 = vmax.f32 %v189_v21, 0.0 }
  0x60   :  { %v193_v25 = vmul.f32 %v192_v22, %v191_v24 }
  0x62   :  { %v194_v26 = vadd.f32 %v193_v25, %v179_v23 }
  0x64   :  { %v197_v27 = vadd.f32 %v196_v0, %v194_v26 }
  0x66   :  { %198 = vst [vmem:[#allocation11] sm:$0xff] %v197_v27 }
  0x67   :  { %319 = shalt.err (!%p316_p10)
}
  0x68   :  { %208 = dma.vmem_to_hbm [thread:$0]  %s206_s17, 128, %s452_s5, [#allocation5]  }
  0x69   :  { %334 = dma.done.wait [#allocation5], 128  }
  0x6a   :  { %335 = vsyncadd [#allocation5], 4294967168 }
  0x6b   :  { %212 = vsyncpa [#allocation4], 1 }
  0x6c   :  { %213 = vsyncpa [#allocation5], 1 }
  0x6d   :  { %214 = vsyncpa [#allocation6], 1 }
  0x6e   :  { %215 = vsyncpa [#allocation9], 1 }

</bundles_post_ra>
